<compile_context>
chip_gen: v6e
topology: v6e:2x2x1
jax: 0.10.0
libtpu: 0.0.40
codegen_flags: <defaults>
</compile_context>

<pallas_src>
import jax
import jax.numpy as jnp
from jax import lax
from jax.experimental import pallas as pl
from jax.experimental.pallas import tpu as pltpu


def instance_head(x_nchw, params):
    """Fused forward pass. x_nchw: (B, CIN, H, W) f32 -> (center, offset) NCHW."""
    ws, sc, bi, wc, bc, wo, bo = params
    B, CIN, H, W = x_nchw.shape            # shapes derived from inputs (not baked in)
    HW = H * W
    CSH = ws.shape[-1]                     # n_tasks * n_channels_per_task (= 64)
    NCPT = wc.shape[0]                     # n_channels_per_task (= 32)
    NOUT = 1 + 2                           # center(1) + offset(2); with_orientation=False
    KK = 9 * CIN                           # conv-matmul contraction size

    # ---- wrapper-side parameter prep (O(weights), tiny) ---------------------
    # shared 3x3 conv weight (HWIO) -> (CSH, 9*CIN), BN scale folded, bf16 MXU operand
    wf_t = (ws.reshape(KK, CSH) * sc[None, :]).T.astype(jnp.bfloat16)
    bf = bi.reshape(CSH, 1).astype(jnp.float32)            # folded BN shift
    # fused block-diagonal 1x1 head weight (NOUT, CSH) + bias (NOUT, 1)
    wh_t = jnp.zeros((NOUT, CSH), jnp.float32)
    wh_t = wh_t.at[0, 0:NCPT].set(wc[:, 0])
    wh_t = wh_t.at[1:3, NCPT:2 * NCPT].set(wo.T)
    bh = jnp.concatenate([bc, bo]).reshape(NOUT, 1).astype(jnp.float32)

    # SAME-padding border masks for the 9 taps: (9, HW) 0/1, shape-only data.
    # Loaded into VMEM once (constant index_map across the grid) -> removes any
    # in-kernel integer div/mod for row/col recovery.
    pix = jnp.arange(HW, dtype=jnp.int32)
    rr, cc = pix // W, pix % W
    valid = jnp.stack(
        [((rr + dy >= 0) & (rr + dy < H) & (cc + dx >= 0) & (cc + dx < W))
         for dy in (-1, 0, 1) for dx in (-1, 0, 1)]).astype(jnp.float32)

    # raw activations, channels on sublanes / pixels on lanes (native NCHW flatten)
    x_flat = x_nchw.reshape(B, CIN, HW)

    def kernel(x_ref, m_ref, wf_ref, bf_ref, wh_ref, bh_ref, out_ref):
        x = x_ref[0]                       # (CIN, HW) f32
        m = m_ref[...]                     # (9, HW) border masks
        # In-kernel im2col: 9 static lane-rolls (XLU) + mask multiplies (VPU).
        # out[p] = x[p + s] (circular), wrapped/out-of-image taps masked to 0,
        # which reproduces the SAME zero padding exactly.
        taps = []
        t = 0
        for dy in (-1, 0, 1):
            for dx in (-1, 0, 1):
                s = dy * W + dx            # tap offset in flattened pixels
                shifted = x if s == 0 else pltpu.roll(x, shift=(-s) % HW, axis=1)
                taps.append(shifted * m[t:t + 1, :])
                t += 1
        patches = jnp.concatenate(taps, axis=0).astype(jnp.bfloat16)   # (9*CIN, HW)
        # 3x3 conv as ONE bf16 MXU matmul with f32 accumulation.
        feat = jnp.dot(wf_ref[...], patches, preferred_element_type=jnp.float32)
        feat = jnp.maximum(feat + bf_ref[...], 0.0)        # folded BN + ReLU
        # fused task heads: (3, CSH) @ (CSH, HW) -> (3, HW)  (cheap, stays f32)
        heads = jnp.dot(wh_ref[...], feat,
                        preferred_element_type=jnp.float32) + bh_ref[...]
        # single-tanh epilogue: sigmoid(x) = 0.5*(tanh(x/2) + 1); one EUP pass.
        row = lax.broadcasted_iota(jnp.int32, heads.shape, 0)   # hoisted, once/step
        is_center = row == 0               # row 0 = center, rows 1..2 = offset
        tval = jnp.tanh(jnp.where(is_center, 0.5 * heads, heads))
        out_ref[0] = jnp.where(is_center, 0.5 * tval + 0.5, tval)
        # TODO(synk): orientation branch (with_orientation=True,
        # OrientationOutputNormalization) not instantiated in this config.

    out = pl.pallas_call(
        kernel,
        out_shape=jax.ShapeDtypeStruct((B, NOUT, HW), jnp.float32),
        grid_spec=pltpu.PrefetchScalarGridSpec(
            num_scalar_prefetch=0,
            grid=(B,),
            in_specs=[
                pl.BlockSpec((1, CIN, HW), lambda b: (b, 0, 0)),
                pl.BlockSpec((9, HW), lambda b: (0, 0)),
                pl.BlockSpec((CSH, KK), lambda b: (0, 0)),
                pl.BlockSpec((CSH, 1), lambda b: (0, 0)),
                pl.BlockSpec((NOUT, CSH), lambda b: (0, 0)),
                pl.BlockSpec((NOUT, 1), lambda b: (0, 0)),
            ],
            out_specs=pl.BlockSpec((1, NOUT, HW), lambda b: (b, 0, 0)),
        ),
        compiler_params=pltpu.CompilerParams(
            dimension_semantics=("parallel",)),
    )(x_flat, valid, wf_t, bf, wh_t, bh)
    # TODO(synk): at production resolutions add an HW (row-block + halo) grid
    # axis sized per-generation VMEM (v7x: 64 MiB) for DMA/compute pipelining;
    # at this toy size a whole image per step already fits comfortably.

    # lane-dense (B, 3, HW) slab -> NCHW outputs: slices + reshapes only.
    center = out[:, 0:1, :].reshape(B, 1, H, W)
    offset = out[:, 1:NOUT, :].reshape(B, 2, H, W)
    return center, offset


def _reference(x_nchw, params):
    """Pure-JAX f32 reference of the same forward pass (correctness check)."""
    ws, sc, bi, wc, bc, wo, bo = params
    NCPT = wc.shape[0]
    y = lax.conv_general_dilated(
        x_nchw, ws, window_strides=(1, 1), padding="SAME",
        dimension_numbers=("NCHW", "HWIO", "NCHW"),
        precision=lax.Precision.HIGHEST)
    y = jnp.maximum(y * sc[None, :, None, None] + bi[None, :, None, None], 0.0)
    c = jax.nn.sigmoid(
        jnp.einsum("bchw,cd->bdhw", y[:, :NCPT], wc,
                   precision=lax.Precision.HIGHEST) + bc[None, :, None, None])
    o = jnp.tanh(
        jnp.einsum("bchw,cd->bdhw", y[:, NCPT:2 * NCPT], wo,
                   precision=lax.Precision.HIGHEST) + bo[None, :, None, None])
    return c, o


if __name__ == "__main__":
    B, CIN, H, W = 2, 4, 16, 16          # small example shapes
    NCPT = 32                            # n_channels_per_task
    CSH = 2 * NCPT                       # shared-conv output channels = 64

    key = jax.random.PRNGKey(0)
    ks = jax.random.split(key, 8)
    # deterministic synthetic parameters (shapes follow the module's __init__)
    ws = 0.1 * jax.random.normal(ks[0], (3, 3, CIN, CSH), jnp.float32)   # shared 3x3 conv (HWIO)
    sc = 1.0 + 0.05 * jax.random.normal(ks[1], (CSH,), jnp.float32)      # folded BN scale
    bi = 0.05 * jax.random.normal(ks[2], (CSH,), jnp.float32)            # folded BN shift
    wc = 0.1 * jax.random.normal(ks[3], (NCPT, 1), jnp.float32)          # center 1x1 conv
    bc = 0.05 * jax.random.normal(ks[4], (1,), jnp.float32)
    wo = 0.1 * jax.random.normal(ks[5], (NCPT, 2), jnp.float32)          # offset 1x1 conv
    bo = 0.05 * jax.random.normal(ks[6], (2,), jnp.float32)
    params = (ws, sc, bi, wc, bc, wo, bo)

    x = jax.random.normal(ks[7], (B, CIN, H, W), jnp.float32)            # NCHW input

    fwd = jax.jit(instance_head)
    center, offset = jax.block_until_ready(fwd(x, params))
    c_ref, o_ref = _reference(x, params)

    assert center.shape == (B, 1, H, W) and offset.shape == (B, 2, H, W)
    # bf16 MXU operands with f32 accumulation -> slightly widened tolerance.
    assert jnp.allclose(center, c_ref, atol=2e-2, rtol=2e-2), \
        float(jnp.max(jnp.abs(center - c_ref)))
    assert jnp.allclose(offset, o_ref, atol=2e-2, rtol=2e-2), \
        float(jnp.max(jnp.abs(offset - o_ref)))
    print("KERNEL_OK")
</pallas_src>

<mosaic_0001>
module attributes {stable_mosaic.version = 11 : i64} {
  func.func @kernel(%arg0: i32, %arg1: memref<1x4x256xf32, #tpu.memory_space<vmem>>, %arg2: memref<9x256xf32, #tpu.memory_space<vmem>>, %arg3: memref<64x36xbf16, #tpu.memory_space<vmem>>, %arg4: memref<64x1xf32, #tpu.memory_space<vmem>>, %arg5: memref<3x64xf32, #tpu.memory_space<vmem>>, %arg6: memref<3x1xf32, #tpu.memory_space<vmem>>, %arg7: memref<1x3x256xf32, #tpu.memory_space<vmem>>) attributes {dimension_semantics = [#tpu.dimension_semantics<parallel>], iteration_bounds = array<i64: 2>, scalar_prefetch = 0 : i64, scratch_operands = 0 : i64, tpu.core_type = #tpu.core_type<tc>, window_params = [{transform_indices = @transform_0, window_bounds = array<i64: 1, 4, 256>}, {pipeline_mode = #tpu.pipeline_mode<synchronous>, transform_indices = @transform_1, window_bounds = array<i64: 9, 256>}, {pipeline_mode = #tpu.pipeline_mode<synchronous>, transform_indices = @transform_2, window_bounds = array<i64: 64, 36>}, {pipeline_mode = #tpu.pipeline_mode<synchronous>, transform_indices = @transform_3, window_bounds = array<i64: 64, 1>}, {pipeline_mode = #tpu.pipeline_mode<synchronous>, transform_indices = @transform_4, window_bounds = array<i64: 3, 64>}, {pipeline_mode = #tpu.pipeline_mode<synchronous>, transform_indices = @transform_5, window_bounds = array<i64: 3, 1>}, {transform_indices = @transform_6, window_bounds = array<i64: 1, 3, 256>}]} {
    %c0 = arith.constant 0 : index
    %c0_0 = arith.constant 0 : index
    %c0_1 = arith.constant 0 : index
    %0 = vector.load %arg1[%c0, %c0_0, %c0_1] : memref<1x4x256xf32, #tpu.memory_space<vmem>>, vector<1x4x256xf32>
    %1 = vector.shape_cast %0 : vector<1x4x256xf32> to vector<4x256xf32>
    %c0_2 = arith.constant 0 : index
    %c0_3 = arith.constant 0 : index
    %2 = vector.load %arg2[%c0_2, %c0_3] : memref<9x256xf32, #tpu.memory_space<vmem>>, vector<9x256xf32>
    %c17_i32 = arith.constant 17 : i32
    %3 = tpu.dynamic_rotate %1 by %c17_i32 dim 1 : vector<4x256xf32>, i32 -> vector<4x256xf32>
    %4 = vector.extract_strided_slice %2 {offsets = [0, 0], sizes = [1, 256], strides = [1, 1]} : vector<9x256xf32> to vector<1x256xf32>
    %5 = vector.broadcast %4 : vector<1x256xf32> to vector<4x256xf32>
    %6 = arith.mulf %3, %5 : vector<4x256xf32>
    %c16_i32 = arith.constant 16 : i32
    %7 = tpu.dynamic_rotate %1 by %c16_i32 dim 1 : vector<4x256xf32>, i32 -> vector<4x256xf32>
    %8 = vector.extract_strided_slice %2 {offsets = [1, 0], sizes = [1, 256], strides = [1, 1]} : vector<9x256xf32> to vector<1x256xf32>
    %9 = vector.broadcast %8 : vector<1x256xf32> to vector<4x256xf32>
    %10 = arith.mulf %7, %9 : vector<4x256xf32>
    %c15_i32 = arith.constant 15 : i32
    %11 = tpu.dynamic_rotate %1 by %c15_i32 dim 1 : vector<4x256xf32>, i32 -> vector<4x256xf32>
    %12 = vector.extract_strided_slice %2 {offsets = [2, 0], sizes = [1, 256], strides = [1, 1]} : vector<9x256xf32> to vector<1x256xf32>
    %13 = vector.broadcast %12 : vector<1x256xf32> to vector<4x256xf32>
    %14 = arith.mulf %11, %13 : vector<4x256xf32>
    %c1_i32 = arith.constant 1 : i32
    %15 = tpu.dynamic_rotate %1 by %c1_i32 dim 1 : vector<4x256xf32>, i32 -> vector<4x256xf32>
    %16 = vector.extract_strided_slice %2 {offsets = [3, 0], sizes = [1, 256], strides = [1, 1]} : vector<9x256xf32> to vector<1x256xf32>
    %17 = vector.broadcast %16 : vector<1x256xf32> to vector<4x256xf32>
    %18 = arith.mulf %15, %17 : vector<4x256xf32>
    %19 = vector.extract_strided_slice %2 {offsets = [4, 0], sizes = [1, 256], strides = [1, 1]} : vector<9x256xf32> to vector<1x256xf32>
    %20 = vector.broadcast %19 : vector<1x256xf32> to vector<4x256xf32>
    %21 = arith.mulf %1, %20 : vector<4x256xf32>
    %c255_i32 = arith.constant 255 : i32
    %22 = tpu.dynamic_rotate %1 by %c255_i32 dim 1 : vector<4x256xf32>, i32 -> vector<4x256xf32>
    %23 = vector.extract_strided_slice %2 {offsets = [5, 0], sizes = [1, 256], strides = [1, 1]} : vector<9x256xf32> to vector<1x256xf32>
    %24 = vector.broadcast %23 : vector<1x256xf32> to vector<4x256xf32>
    %25 = arith.mulf %22, %24 : vector<4x256xf32>
    %c241_i32 = arith.constant 241 : i32
    %26 = tpu.dynamic_rotate %1 by %c241_i32 dim 1 : vector<4x256xf32>, i32 -> vector<4x256xf32>
    %27 = vector.extract_strided_slice %2 {offsets = [6, 0], sizes = [1, 256], strides = [1, 1]} : vector<9x256xf32> to vector<1x256xf32>
    %28 = vector.broadcast %27 : vector<1x256xf32> to vector<4x256xf32>
    %29 = arith.mulf %26, %28 : vector<4x256xf32>
    %c240_i32 = arith.constant 240 : i32
    %30 = tpu.dynamic_rotate %1 by %c240_i32 dim 1 : vector<4x256xf32>, i32 -> vector<4x256xf32>
    %31 = vector.extract_strided_slice %2 {offsets = [7, 0], sizes = [1, 256], strides = [1, 1]} : vector<9x256xf32> to vector<1x256xf32>
    %32 = vector.broadcast %31 : vector<1x256xf32> to vector<4x256xf32>
    %33 = arith.mulf %30, %32 : vector<4x256xf32>
    %c239_i32 = arith.constant 239 : i32
    %34 = tpu.dynamic_rotate %1 by %c239_i32 dim 1 : vector<4x256xf32>, i32 -> vector<4x256xf32>
    %35 = vector.extract_strided_slice %2 {offsets = [8, 0], sizes = [1, 256], strides = [1, 1]} : vector<9x256xf32> to vector<1x256xf32>
    %36 = vector.broadcast %35 : vector<1x256xf32> to vector<4x256xf32>
    %37 = arith.mulf %34, %36 : vector<4x256xf32>
    %38 = tpu.concatenate %6, %10, %14, %18, %21, %25, %29, %33, %37 in 0 : vector<4x256xf32>, vector<4x256xf32>, vector<4x256xf32>, vector<4x256xf32>, vector<4x256xf32>, vector<4x256xf32>, vector<4x256xf32>, vector<4x256xf32>, vector<4x256xf32> -> vector<36x256xf32>
    %39 = arith.truncf %38 : vector<36x256xf32> to vector<36x256xbf16>
    %c0_4 = arith.constant 0 : index
    %c0_5 = arith.constant 0 : index
    %40 = vector.load %arg3[%c0_4, %c0_5] : memref<64x36xbf16, #tpu.memory_space<vmem>>, vector<64x36xbf16>
    %cst = arith.constant dense<0.000000e+00> : vector<64x256xf32>
    %41 = tpu.matmul %40, %39, %cst {dimension_numbers = #tpu.dot_dimension_numbers<[1], [0], [0], [1], [0, 0, 1, 1], [], []>} : vector<64x36xbf16>, vector<36x256xbf16>, vector<64x256xf32> -> vector<64x256xf32>
    %c0_6 = arith.constant 0 : index
    %c0_7 = arith.constant 0 : index
    %42 = vector.load %arg4[%c0_6, %c0_7] : memref<64x1xf32, #tpu.memory_space<vmem>>, vector<64x1xf32>
    %43 = vector.broadcast %42 : vector<64x1xf32> to vector<64x256xf32>
    %44 = arith.addf %41, %43 : vector<64x256xf32>
    %cst_8 = arith.constant 0.000000e+00 : f32
    %45 = vector.broadcast %cst_8 : f32 to vector<64x256xf32>
    %46 = arith.maximumf %44, %45 : vector<64x256xf32>
    %c0_9 = arith.constant 0 : index
    %c0_10 = arith.constant 0 : index
    %47 = vector.load %arg5[%c0_9, %c0_10] : memref<3x64xf32, #tpu.memory_space<vmem>>, vector<3x64xf32>
    %cst_11 = arith.constant dense<0.000000e+00> : vector<3x256xf32>
    %48 = tpu.matmul %47, %46, %cst_11 {dimension_numbers = #tpu.dot_dimension_numbers<[1], [0], [0], [1], [0, 0, 1, 1], [], []>} : vector<3x64xf32>, vector<64x256xf32>, vector<3x256xf32> -> vector<3x256xf32>
    %c0_12 = arith.constant 0 : index
    %c0_13 = arith.constant 0 : index
    %49 = vector.load %arg6[%c0_12, %c0_13] : memref<3x1xf32, #tpu.memory_space<vmem>>, vector<3x1xf32>
    %50 = vector.broadcast %49 : vector<3x1xf32> to vector<3x256xf32>
    %51 = arith.addf %48, %50 : vector<3x256xf32>
    %52 = tpu.iota {dimensions = array<i32: 0>} : vector<3x256xi32>
    %c0_i32 = arith.constant 0 : i32
    %53 = vector.broadcast %c0_i32 : i32 to vector<3x256xi32>
    %54 = arith.cmpi eq, %52, %53 : vector<3x256xi32>
    %cst_14 = arith.constant 5.000000e-01 : f32
    %55 = vector.broadcast %cst_14 : f32 to vector<3x256xf32>
    %56 = arith.mulf %55, %51 : vector<3x256xf32>
    %57 = arith.select %54, %56, %51 : vector<3x256xi1>, vector<3x256xf32>
    %58 = math.tanh %57 : vector<3x256xf32>
    %cst_15 = arith.constant 5.000000e-01 : f32
    %59 = vector.broadcast %cst_15 : f32 to vector<3x256xf32>
    %60 = arith.mulf %59, %58 : vector<3x256xf32>
    %cst_16 = arith.constant 5.000000e-01 : f32
    %61 = vector.broadcast %cst_16 : f32 to vector<3x256xf32>
    %62 = arith.addf %60, %61 : vector<3x256xf32>
    %63 = arith.select %54, %62, %58 : vector<3x256xi1>, vector<3x256xf32>
    %c0_17 = arith.constant 0 : index
    %c0_18 = arith.constant 0 : index
    %c0_19 = arith.constant 0 : index
    %64 = vector.load %arg7[%c0_17, %c0_18, %c0_19] : memref<1x3x256xf32, #tpu.memory_space<vmem>>, vector<1x3x256xf32>
    %65 = vector.shape_cast %64 : vector<1x3x256xf32> to vector<3x256xf32>
    %66 = vector.shape_cast %63 : vector<3x256xf32> to vector<1x3x256xf32>
    tpu.vector_store %arg7[%c0_17, %c0_18, %c0_19], %66 {strides = array<i32>} : memref<1x3x256xf32, #tpu.memory_space<vmem>>, vector<1x3x256xf32>,
    return
  }
  func.func @transform_0(%arg0: i32) -> (i32, i32, i32) {
    %c0_i32 = arith.constant 0 : i32
    %c0_i32_0 = arith.constant 0 : i32
    %c0_i32_1 = arith.constant 0 : i32
    return %arg0, %c0_i32, %c0_i32_0 : i32, i32, i32
  }
  func.func @transform_1(%arg0: i32) -> (i32, i32) {
    %c0_i32 = arith.constant 0 : i32
    %c0_i32_0 = arith.constant 0 : i32
    %c0_i32_1 = arith.constant 0 : i32
    return %c0_i32, %c0_i32_0 : i32, i32
  }
  func.func @transform_2(%arg0: i32) -> (i32, i32) {
    %c0_i32 = arith.constant 0 : i32
    %c0_i32_0 = arith.constant 0 : i32
    %c0_i32_1 = arith.constant 0 : i32
    return %c0_i32, %c0_i32_0 : i32, i32
  }
  func.func @transform_3(%arg0: i32) -> (i32, i32) {
    %c0_i32 = arith.constant 0 : i32
    %c0_i32_0 = arith.constant 0 : i32
    %c0_i32_1 = arith.constant 0 : i32
    return %c0_i32, %c0_i32_0 : i32, i32
  }
  func.func @transform_4(%arg0: i32) -> (i32, i32) {
    %c0_i32 = arith.constant 0 : i32
    %c0_i32_0 = arith.constant 0 : i32
    %c0_i32_1 = arith.constant 0 : i32
    return %c0_i32, %c0_i32_0 : i32, i32
  }
  func.func @transform_5(%arg0: i32) -> (i32, i32) {
    %c0_i32 = arith.constant 0 : i32
    %c0_i32_0 = arith.constant 0 : i32
    %c0_i32_1 = arith.constant 0 : i32
    return %c0_i32, %c0_i32_0 : i32, i32
  }
  func.func @transform_6(%arg0: i32) -> (i32, i32, i32) {
    %c0_i32 = arith.constant 0 : i32
    %c0_i32_0 = arith.constant 0 : i32
    %c0_i32_1 = arith.constant 0 : i32
    return %arg0, %c0_i32, %c0_i32_0 : i32, i32, i32
  }
}

</mosaic_0001>

<bundles_post_ra>
// kernel: instance_head.1
= control target key start
LH: loop header
LB: loop body
LE: loop exit
PB: predicated region body
PF: predicated region fallthrough
CT: control target
= control target key end

     0   :  { %s909_s21 = smov 0   ;;  %s1074_s0 = inlined_call_operand.vmem [shape: f32[2,4,256], index: 0, kind: input, shape index: {}]   ;;  %s1075_s1 = inlined_call_operand.vmem [shape: f32[9,256], index: 1, kind: input, shape index: {}]   ;;  %s1076_s2 = inlined_call_operand.vmem [shape: bf16[64,36], index: 2, kind: input, shape index: {}]   ;;  %s1077_s3 = inlined_call_operand.vmem [shape: f32[64,1], index: 3, kind: input, shape index: {}]   ;;  %s1078_s4 = inlined_call_operand.vmem [shape: f32[3,64], index: 4, kind: input, shape index: {}]   ;;  %s1079_s5 = inlined_call_operand.vmem [shape: f32[3,1], index: 5, kind: input, shape index: {}]   ;;  %s1080_s6 = inlined_call_operand.vmem [shape: f32[2,3,256], index: 6, kind: output, shape index: {}]  }
   0x1 LB: > { %s796_s22 = sadd.s32 4294967295, %s862_s21   ;;  %p800_p0 = scmp.ge.s32.totalorder %s862_s21, 1  ;;  %s862_s21 = sphi %s909_s21, %s16_s21  }
   0x2   : > { %p212_p1 = scmp.lt.s32.totalorder %s862_s21, 3 }
   0x4   : > { %p213_p2 = pnand %p800_p0, %p212_p1 }
   0x5   : > { %p242_p3 = scmp.lt.s32.totalorder (!%p213_p2), %s796_s22, 1  ;;  %s864_s27 = smov (!%p213_p2), 127  }
   0x6   : > { %216 = sbr.rel (%p213_p2) target bundleno = 617 (0x269), region = 44  ;;  %s865_s28 = smov (!%p213_p2), 111  }
   0x7   : > { %s866_s29 = smov (!%p213_p2), 112   ;;  %s867_s30 = smov (!%p213_p2), 113  }
   0x8   : > { %s868_s7 = smov (!%p213_p2), 16   ;;  %s869_s8 = smov (!%p213_p2), 1  }
   0x9   : > { %s871_s9 = smov (!%p213_p2), 17   ;;  %s872_s10 = smov (!%p213_p2), 15  }
   0xb   : > { %s1082_s22 = smov (!%p242_p3, %s796_s22), 1  ;;  %v870_v2 = vmov 0   ;;  %v468_v3 = vld [vmem:[%s1077_s3 + $0x30] sm:$0xff]  ;;  %v469_v4 = vld [vmem:[%s1077_s3 + $0x38] sm:$0xff]  ;;  %v467_v5 = vld [vmem:[%s1077_s3 + $0x28] sm:$0xff]  ;;  %v265_v12 = vlaneseq  ;;  %vm543_vm4 = vcmask 1041408  }
   0xc   : > { %s819_s23 = sshll.u32 %s1082_s22, 3  ;;  %582 = vmatprep.mubr.bf16.mxu0 %v870_v2  ;;  %602 = vmatprep.mubr.bf16.mxu1 %v870_v2  ;;  %v466_v6 = vld [vmem:[%s1077_s3 + $0x20] sm:$0xff]  ;;  %v465_v7 = vld [vmem:[%s1077_s3 + $0x18] sm:$0xff]  ;;  %v464_v8 = vld [vmem:[%s1077_s3 + $0x10] sm:$0xff]  ;;  %vm439_vm5 = vcmask 1043456   ;;  %vm530_vm10 = vcmask 293888  }
   0xd   : > { %s246_s26 = scalar_lea.vmem %s1074_s0, %s819_s23  ;;  %846 = vset.pattern.permute.xlu1 %v870_v2  ;;  %845 = vset.pattern.permute.xlu0 %v870_v2  ;;  %v463_v9 = vld [vmem:[%s1077_s3 + $0x8] sm:$0xff]  ;;  %v462_v10 = vld [vmem:[%s1077_s3] sm:$0xff]  ;;  %v968_v13 = vshrl.u32 %v265_v12, 7  ;;  %v981_v17 = vand.u32 127, %v265_v12  ;;  %v805_v34 = vld [vmem:[%s1075_s1 + $0x10] ss:$0 sm:$0xff] }
   0xe   : > { %v925_v0 = vld [vmem:[%s246_s26] sm:$0xff]  ;;  %v979_v16 = vld [vmem:[%s1075_s1 + $0x8] sm:$0xff]  ;;  %v806_v35 = vld [vmem:[%s1075_s1 + $0x18] ss:$0 sm:$0xff]  ;;  %vm646_vm11 = vcmask 523264  }
   0xf   : > { %344 = vrot.lane.b32.xlu1 %v925_v0, %s864_s27  ;;  %395 = vrot.lane.b32.xlu0 %v925_v0, %s865_s28  ;;  %v259_v1 = vcombine.high %v925_v0, %v925_v0  ;;  %v640_v11 = vld [vmem:[%s1079_s5] sm:$0x7]  ;;  %v333_v14 = vsub.s32 4, %v968_v13  ;;  %v353_v22 = vsub.s32 5, %v968_v13  ;;  %vm348_vm0 = vcmp.lt.s32.totalorder %v981_v17, 127 }
  0x10   : > { %v974_v15 = vld [vmem:[%s1075_s1] sm:$0xff]  ;;  %v387_v23 = vsub.s32 7, %v968_v13  ;;  %v370_v29 = vsub.s32 6, %v968_v13  ;;  %vm382_vm1 = vcmp.lt.s32.totalorder %v981_v17, 112  ;;  %vm399_vm2 = vcmp.lt.s32.totalorder %v981_v17, 111 }
  0x11   : > { %v334_v18 = vrot.slane %v974_v15, %v333_v14  ;;  %v338_v19 = vrot.slane %v979_v16, %v333_v14  ;;  %v354_v26 = vrot.slane %v974_v15, %v353_v22  ;;  %v358_v27 = vrot.slane %v979_v16, %v353_v22 }
  0x12   : > { %v388_v32 = vrot.slane %v974_v15, %v387_v23  ;;  %v392_v33 = vrot.slane %v979_v16, %v387_v23  ;;  %vm365_vm3 = vcmp.lt.s32.totalorder %v981_v17, 113  ;;  %v371_v41 = vrot.slane %v974_v15, %v370_v29 }
  0x13   : > { %378 = vrot.lane.b32.xlu0 %v925_v0, %s866_s29  ;;  %346 = vrot.lane.b32.xlu1 %v259_v1, %s864_s27  ;;  %v341_v24 = vcombine.low %v334_v18, %v338_v19  ;;  %v375_v42 = vrot.slane %v979_v16, %v370_v29  ;;  %vm284_vm6 = vcmp.lt.s32.totalorder %v981_v17, 16  ;;  %vm318_vm7 = vcmp.lt.s32.totalorder %v981_v17, 1 }
  0x14   : > { %v272_v18 = vsub.s32 0, %v968_v13  ;;  %vm267_vm8 = vcmp.lt.s32.totalorder %v981_v17, 17  ;;  %vm301_vm9 = vcmp.lt.s32.totalorder %v981_v17, 15  ;;  %v848_v17 = vld [vmem:[%s1076_s2] sm:$0xff]   ;;  %vm723_vm12 = vcmp.eq.s32.totalorder %v968_v13, 0 }
  0x15   : > { %v343_v36 = vmul.f32 %v341_v24, %v925_v0 }
  0x16   : > { %v273_v29 = vrot.slane %v974_v15, %v272_v18 }
  0x17   : > { %380 = vrot.lane.b32.xlu1 %v259_v1, %s866_s29  ;;  %397 = vrot.lane.b32.xlu0 %v259_v1, %s865_s28  ;;  %v425_v51 = vcombine.high %v343_v36, %v343_v36 }
  0x1b   : > { %363 = vrot.lane.b32.xlu1 %v259_v1, %s867_s30  ;;  %361 = vrot.lane.b32.xlu0 %v925_v0, %s867_s30 }
  0x1f   : > { %282 = vrot.lane.b32.xlu1 %v259_v1, %s868_s7  ;;  %280 = vrot.lane.b32.xlu0 %v925_v0, %s868_s7  ;;  %s251_s7 = scalar_lea.vmem %s1080_s6, %s819_s23 }
  0x23   : > { %316 = vrot.lane.b32.xlu1 %v259_v1, %s869_s8  ;;  %314 = vrot.lane.b32.xlu0 %v925_v0, %s869_s8 }
  0x27   : > { %263 = vrot.lane.b32.xlu1 %v259_v1, %s871_s9  ;;  %261 = vrot.lane.b32.xlu0 %v925_v0, %s871_s9 }
  0x2b   : > { %299 = vrot.lane.b32.xlu1 %v259_v1, %s872_s10  ;;  %297 = vrot.lane.b32.xlu0 %v925_v0, %s872_s10 }
  0x2f   : > { %502 = vperm.xlu1 %846, %v468_v3   ;;  %507 = vperm.xlu0 %845, %v469_v4  }
  0x33   : > { %497 = vperm.xlu1 %846, %v467_v5   ;;  %492 = vperm.xlu0 %845, %v466_v6  }
  0x37   : > { %487 = vperm.xlu1 %846, %v465_v7   ;;  %482 = vperm.xlu0 %845, %v464_v8   ;;  %v289_v8 = vsub.s32 1, %v968_v13 }
  0x39   : > { %v290_v19 = vrot.slane %v974_v15, %v289_v8 }
  0x3b   : > { %477 = vperm.xlu1 %846, %v463_v9   ;;  %472 = vperm.xlu0 %845, %v462_v10  }
  0x3f   : > { %643 = vperm.xlu1 %846, %v640_v11   ;;  %v323_v11 = vsub.s32 3, %v968_v13 }
  0x41   : > { %v328_v22 = vrot.slane %v979_v16, %v323_v11 }
  0x81   : > { %v345_v20 = vpop.permute.xlu1 %344  ;;  %v396_v21 = vpop.permute.xlu0 %395 }
  0x85   : > { %v379_v25 = vpop.permute.xlu0 %378  ;;  %v347_v28 = vpop.permute.xlu1 %346 }
  0x86   : > { %v349_v30 = vsel %vm348_vm0, %v345_v20, %v347_v28  ;;  %v350_v31 = vsel %vm348_vm0, %v347_v28, %v345_v20  ;;  %v294_v20 = vrot.slane %v979_v16, %v289_v8 }
  0x87   : > { %v359_v37 = vmul.f32 %v354_v26, %v349_v30  ;;  %v360_v38 = vmul.f32 %v358_v27, %v350_v31  ;;  %v277_v30 = vrot.slane %v979_v16, %v272_v18 }
  0x89   : > { %v381_v39 = vpop.permute.xlu1 %380  ;;  %v398_v40 = vpop.permute.xlu0 %397  ;;  %v429_v52 = vrot.slane %v359_v37, 4  ;;  %v430_v53 = vrot.slane %v360_v38, 4 }
  0x8a   : > { %v383_v43 = vsel %vm382_vm1, %v379_v25, %v381_v39  ;;  %v384_v44 = vsel %vm382_vm1, %v381_v39, %v379_v25  ;;  %v400_v45 = vsel %vm399_vm2, %v396_v21, %v398_v40  ;;  %v401_v46 = vsel %vm399_vm2, %v398_v40, %v396_v21 }
  0x8b   : > { %v393_v47 = vmul.f32 %v388_v32, %v383_v43  ;;  %v394_v48 = vmul.f32 %v392_v33, %v384_v44  ;;  %v410_v49 = vmul.f32 %v805_v34, %v400_v45  ;;  %v411_v50 = vmul.f32 %v806_v35, %v401_v46 }
  0x8c   : > { %v445_v4 = vsel %vm439_vm5, %v425_v51, %v430_v53  ;;  %v444_v6 = vsel %vm439_vm5, %v343_v36, %v429_v52  ;;  %v324_v21 = vrot.slane %v974_v15, %v323_v11  ;;  %v306_v25 = vsub.s32 2, %v968_v13 }
  0x8d   : > { %v364_v54 = vpop.permute.xlu1 %363  ;;  %v362_v55 = vpop.permute.xlu0 %361  ;;  %v453_v56 = vpack.c.bf16 %v411_v50, %v411_v50  ;;  %v452_v57 = vpack.c.bf16 %v410_v49, %v410_v49  ;;  %v435_v58 = vrot.slane %v393_v47, 4  ;;  %v436_v61 = vrot.slane %v394_v48, 4 }
  0x8e   : > { %v366_v59 = vsel %vm365_vm3, %v362_v55, %v364_v54  ;;  %v367_v60 = vsel %vm365_vm3, %v364_v54, %v362_v55  ;;  %v307_v38 = vrot.slane %v974_v15, %v306_v25  ;;  %v311_v39 = vrot.slane %v979_v16, %v306_v25 }
  0x8f   : > { %v376_v62 = vmul.f32 %v371_v41, %v366_v59  ;;  %v377_v63 = vmul.f32 %v375_v42, %v367_v60  ;;  %811 = vmatprep.subr.msk.bf16.mxu0 %vm543_vm4, %v453_v56  ;;  %821 = vmatprep.subr.msk.bf16.mxu1 %vm543_vm4, %v453_v56  ;;  %v545_v0 = vsel %vm543_vm4, %v452_v57, 0  ;;  %v849_v56 = vld [vmem:[%s1076_s2 + $0x10] sm:$0xff]   ;;  %v850_v57 = vld [vmem:[%s1076_s2 + $0x8] sm:$0xff]   ;;  %v873_v59 = vmov 0.0  }
  0x90   : > { %561 = vmatpush1.bf16.msra.mxu0 %v545_v0  ;;  %824 = vmatpush1.bf16.msra.mxu1 %v545_v0 }
  0x91   : > { %v283_v1 = vpop.permute.xlu1 %282  ;;  %v281_v3 = vpop.permute.xlu0 %280  ;;  %v447_v5 = vsel %vm439_vm5, %v377_v63, %v436_v61  ;;  %v446_v7 = vsel %vm439_vm5, %v376_v62, %v435_v58  ;;  %v851_v58 = vld [vmem:[%s1076_s2 + $0x18] sm:$0xff]  }
  0x92   : > { %v451_v9 = vpack.c.bf16 %v447_v5, %v445_v4  ;;  %v450_v10 = vpack.c.bf16 %v446_v7, %v444_v6  ;;  %v285_v23 = vsel %vm284_vm6, %v281_v3, %v283_v1  ;;  %v286_v24 = vsel %vm284_vm6, %v283_v1, %v281_v3 }
  0x93   : > { %v295_v32 = vmul.f32 %v290_v19, %v286_v24  ;;  %v296_v33 = vmul.f32 %v294_v20, %v285_v23 }
  0x94   : > { %562 = vmatprep.subr.bf16.mxu0 %v451_v9  ;;  %822 = vmatprep.subr.bf16.mxu1 %v451_v9 }
  0x95   : > { %v317_v12 = vpop.permute.xlu1 %316  ;;  %563 = vmatpush1.bf16.msra.mxu0 %v450_v10  ;;  %825 = vmatpush1.bf16.msra.mxu1 %v450_v10  ;;  %v315_v14 = vpop.permute.xlu0 %314  ;;  %v414_v44 = vrot.slane %v295_v32, 4  ;;  %v415_v45 = vrot.slane %v296_v33, 4 }
  0x96   : > { %v319_v26 = vsel %vm318_vm7, %v315_v14, %v317_v12  ;;  %v320_v27 = vsel %vm318_vm7, %v317_v12, %v315_v14 }
  0x97   : > { %v329_v36 = vmul.f32 %v324_v21, %v320_v27  ;;  %v330_v37 = vmul.f32 %v328_v22, %v319_v26 }
  0x99   : > { %v264_v28 = vpop.permute.xlu1 %263  ;;  %v262_v31 = vpop.permute.xlu0 %261  ;;  %v420_v48 = vrot.slane %v329_v36, 4  ;;  %v421_v49 = vrot.slane %v330_v37, 4 }
  0x9a   : > { %v268_v34 = vsel %vm267_vm8, %v262_v31, %v264_v28  ;;  %v269_v35 = vsel %vm267_vm8, %v264_v28, %v262_v31 }
  0x9b   : > { %v278_v40 = vmul.f32 %v273_v29, %v269_v35  ;;  %v279_v41 = vmul.f32 %v277_v30, %v268_v34 }
  0x9d   : > { %v300_v42 = vpop.permute.xlu1 %299  ;;  %v298_v43 = vpop.permute.xlu0 %297  ;;  %v441_v15 = vsel %vm439_vm5, %v279_v41, %v415_v45  ;;  %v440_v52 = vsel %vm439_vm5, %v278_v40, %v414_v44 }
  0x9e   : > { %v302_v46 = vsel %vm301_vm9, %v298_v43, %v300_v42  ;;  %v303_v47 = vsel %vm301_vm9, %v300_v42, %v298_v43 }
  0x9f   : > { %v312_v50 = vmul.f32 %v307_v38, %v303_v47  ;;  %v313_v51 = vmul.f32 %v311_v39, %v302_v46 }
  0xa1   : > { %v443_v16 = vsel %vm439_vm5, %v313_v51, %v421_v49  ;;  %v442_v53 = vsel %vm439_vm5, %v312_v50, %v420_v48 }
  0xa2   : > { %v449_v54 = vpack.c.bf16 %v443_v16, %v441_v15  ;;  %v448_v55 = vpack.c.bf16 %v442_v53, %v440_v52 }
  0xa4   : > { %564 = vmatprep.subr.bf16.mxu0 %v449_v54  ;;  %823 = vmatprep.subr.bf16.mxu1 %v449_v54  ;;  %v639_v54 = vld [vmem:[%s1078_s4] sm:$0x7] }
  0xa5   : > { %565 = vmatpush1.bf16.msra.mxu0 %v448_v55  ;;  %826 = vmatpush1.bf16.msra.mxu1 %v448_v55 }
  0xa8   : > { %812 = vmatmul.mubr.msk.bf16.vlgmr.msra.gmra.mxu0 %vm530_vm10, %v848_v17  ;;  %814 = vmatmul.mubr.msk.bf16.vlgmr.msra.gmra.mxu1 %vm530_vm10, %v849_v56 }
  0xa9   : > { %592 = vmatprep.mubr.bf16.mxu0 %v870_v2  ;;  %612 = vmatprep.mubr.bf16.mxu1 %v870_v2 }
  0xaa   : > { %v503_v0 = vpop.permute.xlu1 %502  ;;  %v508_v2 = vpop.permute.xlu0 %507 }
  0xae   : > { %v498_v8 = vpop.permute.xlu1 %497  ;;  %v493_v11 = vpop.permute.xlu0 %492 }
  0xb0   : > { %813 = vmatmul.mubr.msk.bf16.gmra.mxu0 %vm530_vm10, %v850_v57  ;;  %815 = vmatmul.mubr.msk.bf16.gmra.mxu1 %vm530_vm10, %v851_v58 }
  0xb1   : > { %714 = vmatprep.mubr.f32.mxu1 %v873_v59 }
  0xb2   : > { %v488_v22 = vpop.permute.xlu1 %487  ;;  %v483_v27 = vpop.permute.xlu0 %482 }
  0xb6   : > { %v478_v37 = vpop.permute.xlu1 %477  ;;  %v473_v43 = vpop.permute.xlu0 %472 }
  0xba   : > { %v644_v55 = vpop.permute.xlu1 %643 }
 0x168   : > { %v584_v60 = vpop.f32.mrf.mxu0  ;;  %v604_v61 = vpop.f32.mrf.mxu1 }
 0x169   : > { %v605_v32 = vadd.f32 %v604_v61, %v493_v11  ;;  %v585_v51 = vadd.f32 %v584_v60, %v473_v43 }
 0x16a   : > { %v586_v62 = vpop.f32.mrf.mxu0  ;;  %v606_v63 = vpop.f32.mrf.mxu1 }
 0x16b   : > { %v607_v30 = vadd.f32 %v606_v63, %v493_v11  ;;  %v631_v41 = vmax.f32 %v605_v32, 0.0  ;;  %v587_v48 = vadd.f32 %v586_v62, %v473_v43  ;;  %v623_v53 = vmax.f32 %v585_v51, 0.0 }
 0x16c   : > { %v588_v1 = vpop.f32.mrf.mxu0  ;;  %v608_v3 = vpop.f32.mrf.mxu1 }
 0x16d   : > { %v609_v26 = vadd.f32 %v608_v3, %v498_v8  ;;  %v632_v39 = vmax.f32 %v607_v30, 0.0  ;;  %v589_v46 = vadd.f32 %v588_v1, %v478_v37  ;;  %v624_v52 = vmax.f32 %v587_v48, 0.0 }
 0x16e   : > { %v590_v4 = vpop.f32.mrf.mxu0  ;;  %v610_v5 = vpop.f32.mrf.mxu1 }
 0x16f   : > { %v611_v24 = vadd.f32 %v610_v5, %v498_v8  ;;  %v633_v36 = vmax.f32 %v609_v26, 0.0  ;;  %v591_v44 = vadd.f32 %v590_v4, %v478_v37  ;;  %v625_v16 = vmax.f32 %v589_v46, 0.0 }
 0x170   : > { %v594_v6 = vpop.f32.mrf.mxu0  ;;  %v614_v7 = vpop.f32.mrf.mxu1 }
 0x171   : > { %v615_v23 = vadd.f32 %v614_v7, %v503_v0  ;;  %v634_v34 = vmax.f32 %v611_v24, 0.0  ;;  %v595_v42 = vadd.f32 %v594_v6, %v483_v27  ;;  %v626_v15 = vmax.f32 %v591_v44, 0.0 }
 0x172   : > { %v596_v9 = vpop.f32.mrf.mxu0  ;;  %v616_v10 = vpop.f32.mrf.mxu1 }
 0x173   : > { %v617_v20 = vadd.f32 %v616_v10, %v503_v0  ;;  %v635_v33 = vmax.f32 %v615_v23, 0.0  ;;  %v597_v40 = vadd.f32 %v596_v9, %v483_v27  ;;  %v627_v50 = vmax.f32 %v595_v42, 0.0 }
 0x174   : > { %v618_v12 = vpop.f32.mrf.mxu1  ;;  %v598_v14 = vpop.f32.mrf.mxu0 }
 0x175   : > { %v619_v18 = vadd.f32 %v618_v12, %v508_v2  ;;  %v636_v31 = vmax.f32 %v617_v20, 0.0  ;;  %v599_v38 = vadd.f32 %v598_v14, %v488_v22  ;;  %v628_v49 = vmax.f32 %v597_v40, 0.0 }
 0x176   : > { %v620_v19 = vpop.f32.mrf.mxu1  ;;  %v600_v29 = vpop.f32.mrf.mxu0 }
 0x177   : > { %v621_v21 = vadd.f32 %v620_v19, %v508_v2  ;;  %v637_v28 = vmax.f32 %v619_v18, 0.0  ;;  %v601_v35 = vadd.f32 %v600_v29, %v488_v22  ;;  %v629_v47 = vmax.f32 %v599_v38, 0.0 }
 0x179   : > { %v638_v25 = vmax.f32 %v621_v21, 0.0  ;;  %v630_v45 = vmax.f32 %v601_v35, 0.0 }
 0x17b   : > { %666 = vmatprep.subr.mxu1 %v638_v25 }
 0x17c   : > { %667 = vmatpush1.msra.mxu1 %v637_v28 }
 0x17d   : > { %668 = vmatprep.subr.mxu1 %v636_v31 }
 0x17e   : > { %669 = vmatpush1.msra.mxu1 %v635_v33 }
 0x17f   : > { %670 = vmatprep.subr.mxu1 %v634_v34 }
 0x180   : > { %671 = vmatpush1.msra.mxu1 %v633_v36 }
 0x181   : > { %672 = vmatprep.subr.mxu1 %v632_v39 }
 0x182   : > { %673 = vmatpush1.msra.mxu1 %v631_v41 }
 0x183   : > { %674 = vmatprep.subr.mxu1 %v630_v45 }
 0x184   : > { %675 = vmatpush1.msra.mxu1 %v629_v47 }
 0x185   : > { %676 = vmatprep.subr.mxu1 %v628_v49 }
 0x186   : > { %677 = vmatpush1.msra.mxu1 %v627_v50 }
 0x187   : > { %678 = vmatprep.subr.mxu1 %v626_v15 }
 0x188   : > { %679 = vmatpush1.msra.mxu1 %v625_v16 }
 0x189   : > { %680 = vmatprep.subr.mxu1 %v624_v52 }
 0x18a   : > { %681 = vmatpush1.msra.mxu1 %v623_v53 }
 0x18b   : > { %816 = vmatmul.mubr.msk.f32.vlgmr.msra.gmra.mxu1 %vm646_vm11, %v639_v54 }
 0x24b   : > { %v716_v17 = vpop.f32.mrf.mxu1 }
 0x24c   : > { %v717_v56 = vadd.f32 %v716_v17, %v644_v55 }
 0x24d   : > { %v718_v57 = vpop.f32.mrf.mxu1 }
 0x24e   : > { %v724_v58 = vmul.f32 0.5, %v717_v56  ;;  %v719_v59 = vadd.f32 %v718_v57, %v644_v55 }
 0x250   : > { %v726_v60 = vsel %vm723_vm12, %v724_v58, %v717_v56  ;;  %v725_v61 = vmul.f32 0.5, %v719_v59 }
 0x251   : > { %852 = vtanh.f32 %v726_v60 }
 0x252   : > { %v727_v62 = vsel %vm723_vm12, %v725_v61, %v719_v59 }
 0x253   : > { %854 = vtanh.f32 %v727_v62 }
 0x25e   : > { %v853_v63 = vpop.eup %852 }
 0x25f   : > { %v730_v0 = vmul.f32 0.5, %v853_v63 }
 0x260   : > { %v855_v1 = vpop.eup %854 }
 0x261   : > { %v732_v3 = vadd.f32 0.5, %v730_v0  ;;  %v731_v2 = vmul.f32 0.5, %v855_v1 }
 0x263   : > { %v733_v4 = vadd.f32 0.5, %v731_v2  ;;  %v734_v5 = vsel %vm723_vm12, %v732_v3, %v853_v63 }
 0x265   : > { %v735_v6 = vsel %vm723_vm12, %v733_v4, %v855_v1 }
 0x266   : > { %v738_v7 = vcombine.low %v734_v5, %v735_v6 }
 0x268   : > { %740 = vst [vmem:[%s251_s7] sm:$0x77] %v738_v7 }
 0x269 PF: > { %s16_s21 = sadd.s32 1, %s862_s21  }
 0x26a   : > { %p13_p4 = scmp.ge.s32.totalorder %s16_s21, 4  }
 0x26c   :  { %15 = sbr.rel (!%p13_p4) target bundleno = 1 (0x1), region = 74 }

</bundles_post_ra>
